<compile_context>
chip_gen: v7x
topology: tpu7x:2x2x1
jax: 0.10.0
libtpu: 0.0.40
codegen_flags: <defaults>
</compile_context>

<pallas_src>
import functools

import jax
import jax.numpy as jnp
from jax.experimental import pallas as pl
from jax.experimental.pallas import tpu as pltpu


_TRANS_B_DIMS = (((1,), (1,)), ((), ()))  # contract last dim of lhs with last dim of rhs


# ------------------------------ fused kernel ------------------------------- #

def _tcn_fused_kernel(*refs, num_layers, kernel_size, dilations, cins, couts, t, bt):
    # ref layout:
    #   refs[0]                       : x          (Bt, T, Cin)
    #   refs[1 : 1+L]                 : w_cat_i    (K*Cin_i, Cout_i)  bf16
    #   refs[1+L]                     : bias pack  (L+1, Cmax)        f32 (row L = fc bias)
    #   refs[2+L]                     : fc_w       (1, C_last)        bf16
    #   refs[3+L]                     : output     (Bt, 1, T)
    #   refs[4+L], refs[5+L]          : ping-pong im2col scratch (Bt*T, max K*Cin)  f32
    x_ref = refs[0]
    w_refs = refs[1:1 + num_layers]
    bias_ref = refs[1 + num_layers]
    fcw_ref = refs[2 + num_layers]
    o_ref = refs[3 + num_layers]
    bufs = refs[4 + num_layers:6 + num_layers]

    rows = bt * t

    def stage(dst, row_payload, cin, dilation):
        # im2col staging: write the payload K times at column offsets j*cin with a row
        # shift of j*dilation - pad, zeroing the out-of-range rows of each column block.
        # All slice bounds are static Python ints.
        pad = (kernel_size - 1) * dilation // 2
        for b in range(bt):                          # static unroll over batch rows
            payload = row_payload(b)                 # (t, cin)
            r0 = b * t
            for j in range(kernel_size):             # static unroll over kernel taps
                c0 = j * cin
                s = j * dilation - pad               # input shift for this tap
                lo = min(t, max(0, -s))              # first valid output row
                hi = max(0, min(t, t - s))           # one-past-last valid output row
                if lo > 0:
                    dst[r0:r0 + lo, c0:c0 + cin] = jnp.zeros((lo, cin), dst.dtype)
                if hi < t:
                    dst[r0 + hi:r0 + t, c0:c0 + cin] = jnp.zeros((t - hi, cin), dst.dtype)
                if hi > lo:
                    dst[r0 + lo:r0 + hi, c0:c0 + cin] = (
                        payload[lo + s:hi + s, :].astype(dst.dtype))

    # Layer 0: stage the input block (fused "same" padding, no HBM pad materialized).
    stage(bufs[0], lambda b: x_ref[b], cins[0], dilations[0])

    h = None
    for i in range(num_layers):                      # static unroll over layers
        kc = kernel_size * cins[i]
        cout = couts[i]
        src = bufs[i % 2]
        # One im2col matmul per layer: bf16 operands, f32 accumulation on the MXU.
        xcat = src[0:rows, 0:kc].astype(jnp.bfloat16)            # (Bt*T, K*Cin_i)
        acc = jnp.dot(xcat, w_refs[i][...], preferred_element_type=jnp.float32)
        acc = acc + bias_ref[i:i + 1, 0:cout]                    # f32 bias add
        h = jnp.maximum(acc, 0.0)                    # ReLU; nn.Dropout = identity (eval)
        if i + 1 < num_layers:                       # stage next layer's im2col input
            stage(bufs[(i + 1) % 2],
                  lambda b, h=h: h[b * t:(b + 1) * t, :],
                  cins[i + 1], dilations[i + 1])

    # Fused O=1 linear head: per batch row, (1, C) x (T, C)^T -> lane-dense (1, T) row.
    w_row = fcw_ref[...]                             # (1, C_last) bf16
    out_rows = []
    for b in range(bt):
        hb = h[b * t:(b + 1) * t, :].astype(jnp.bfloat16)
        out_rows.append(jax.lax.dot_general(w_row, hb, _TRANS_B_DIMS,
                                            preferred_element_type=jnp.float32))
    out = out_rows[0] if bt == 1 else jnp.concatenate(out_rows, axis=0)   # (bt, t)
    out = out + bias_ref[num_layers:num_layers + 1, 0:1]                  # fc bias
    o_ref[...] = out.reshape(bt, 1, t).astype(o_ref.dtype)


# ------------------------------ model wrapper ------------------------------ #

def _choose_batch_block(b, t, batch_block=None):
    """Pick rows-per-step: grow Bt toward Bt*T >= 128 while keeping >= 2 grid steps
    when the batch allows it (v7x has 2 TensorCores sharding the parallel axis)."""
    if batch_block is not None:
        assert b % batch_block == 0
        return batch_block
    target = max(1, -(-128 // t))                    # ceil(128 / T)
    best = 1
    for cand in range(1, b + 1):
        if b % cand:
            continue
        if b // cand < 2 and b >= 2:
            continue
        if cand <= target:
            best = cand
    return best


def tcn_model_forward(params, x, kernel_size, batch_block=None):
    """x: (B, T, input_size) -> (B, T)  (matches TCNModel.forward with output_size=1)."""
    B, T, Cin = x.shape
    conv = params["conv"]
    num_layers = len(conv)
    dilations = tuple(int(d) for (_, _, d) in conv)
    cins = tuple(int(w.shape[1]) for (w, _, _) in conv)
    couts = tuple(int(w.shape[2]) for (w, _, _) in conv)
    for d in dilations:
        # Odd kernel_size keeps T constant per layer (same as the PyTorch reference).
        assert (kernel_size - 1) * d % 2 == 0, "odd kernel_size required"
    assert cins[0] == Cin

    fc_w, fc_b = params["fc_w"], params["fc_b"]      # fc_w: (O, C_last) PyTorch layout
    out_size, c_last = fc_w.shape
    assert out_size == 1                             # TODO(synk): generalize head to O > 1
    assert c_last == couts[-1]

    bt = _choose_batch_block(B, T, batch_block)
    steps = B // bt
    rows = bt * T
    max_kc = max(kernel_size * ci for ci in cins)
    cmax = max(max(couts), 1)

    # Host-side prep: im2col weight layout (K*Cin, Cout) in bf16; all biases packed
    # into a single small f32 block (row num_layers, col 0 holds the fc bias).
    w_cats = [w.reshape(kernel_size * cins[i], couts[i]).astype(jnp.bfloat16)
              for i, (w, _, _) in enumerate(conv)]
    bias_pack = jnp.zeros((num_layers + 1, cmax), jnp.float32)
    for i, (_, b, _) in enumerate(conv):
        bias_pack = bias_pack.at[i, :couts[i]].set(b.astype(jnp.float32))
    bias_pack = bias_pack.at[num_layers, 0].set(fc_b[0].astype(jnp.float32))
    fc_w_bf = fc_w.astype(jnp.bfloat16)              # (1, C_last)

    inputs = [x] + w_cats + [bias_pack, fc_w_bf]
    in_specs = [pl.BlockSpec((bt, T, Cin), lambda i: (i, 0, 0))]
    in_specs += [pl.BlockSpec(w.shape, lambda i: (0, 0)) for w in w_cats]
    in_specs += [pl.BlockSpec(bias_pack.shape, lambda i: (0, 0)),
                 pl.BlockSpec(fc_w_bf.shape, lambda i: (0, 0))]

    # Two ping-pong staging buffers sized to the widest layer (only layers i and i+1
    # are ever live), instead of one whole-lifetime buffer per layer.
    scratch_shapes = [pltpu.VMEM((rows, max_kc), jnp.float32),
                      pltpu.VMEM((rows, max_kc), jnp.float32)]

    # Explicit scoped-VMEM budget: scratch + double-buffered in/out blocks + headroom.
    vmem_est = 2 * rows * max_kc * 4                                   # ping-pong scratch
    vmem_est += 2 * (bt * T * Cin * x.dtype.itemsize + bt * T * 4)     # dbl-buffered I/O
    vmem_est += 2 * sum(int(a.size) * a.dtype.itemsize for a in inputs[1:])
    vmem_limit = int(min(64 << 20, max(16 << 20, 2 * vmem_est)))

    kernel = functools.partial(
        _tcn_fused_kernel, num_layers=num_layers, kernel_size=kernel_size,
        dilations=dilations, cins=cins, couts=couts, t=T, bt=bt)

    out3 = pl.pallas_call(
        kernel,
        out_shape=jax.ShapeDtypeStruct((B, 1, T), x.dtype),
        grid=(steps,),
        in_specs=in_specs,
        out_specs=pl.BlockSpec((bt, 1, T), lambda i: (i, 0, 0)),
        scratch_shapes=scratch_shapes,
        compiler_params=pltpu.CompilerParams(
            dimension_semantics=("parallel",),
            vmem_limit_bytes=vmem_limit),
    )(*inputs)
    return jnp.squeeze(out3, 1)                      # (B, T)


# ------------------------------- param init -------------------------------- #

def init_params(key, input_size, output_size, num_channels, kernel_size):
    """Deterministic parameter init (PyTorch-style uniform bounds)."""
    params = {"conv": []}
    in_ch = input_size
    for i, out_ch in enumerate(num_channels):
        key, k1, k2 = jax.random.split(key, 3)
        bound = 1.0 / float(in_ch * kernel_size) ** 0.5
        # stored as (K, Cin, Cout) == PyTorch Conv1d weight (Cout, Cin, K) transposed
        w = jax.random.uniform(k1, (kernel_size, in_ch, out_ch), jnp.float32, -bound, bound)
        b = jax.random.uniform(k2, (out_ch,), jnp.float32, -bound, bound)
        params["conv"].append((w, b, 2 ** i))
        in_ch = out_ch
    key, k1, k2 = jax.random.split(key, 3)
    bound = 1.0 / float(in_ch) ** 0.5
    # stored in PyTorch Linear layout (O, C)
    params["fc_w"] = jax.random.uniform(k1, (output_size, in_ch), jnp.float32, -bound, bound)
    params["fc_b"] = jax.random.uniform(k2, (output_size,), jnp.float32, -bound, bound)
    return params


# ------------------------- pure-JAX reference check ------------------------ #

def reference_forward(params, x, kernel_size, matmul_dtype=jnp.float32):
    """Pure-JAX reference; matmul_dtype controls the matmul operand precision
    (f32 accumulation in all cases), mirroring the kernel's bf16-operand MXU path."""
    h = jnp.transpose(x, (0, 2, 1))                  # (B, C, T) like PyTorch NCW
    for (w, b, dilation) in params["conv"]:
        w_ncw = jnp.transpose(w, (2, 1, 0)).astype(matmul_dtype)   # (Cout, Cin, K)
        pad = (kernel_size - 1) * dilation // 2
        h = jax.lax.conv_general_dilated(
            h.astype(matmul_dtype), w_ncw, window_strides=(1,), padding=[(pad, pad)],
            rhs_dilation=(dilation,), dimension_numbers=("NCH", "OIH", "NCH"),
            preferred_element_type=jnp.float32)
        h = jnp.maximum(h + b[None, :, None], 0.0)
    h = jnp.transpose(h, (0, 2, 1))                  # (B, T, C)
    out = jax.lax.dot_general(h.astype(matmul_dtype),
                              params["fc_w"].astype(matmul_dtype),
                              (((2,), (1,)), ((), ())),
                              preferred_element_type=jnp.float32)  # (B, T, 1)
    out = out + params["fc_b"]
    return jnp.squeeze(out, -1)


# ---------------------------------- main ----------------------------------- #

if __name__ == "__main__":
    B, T, input_size = 4, 16, 8
    num_channels = (16, 32)
    kernel_size = 3
    output_size = 1

    key = jax.random.PRNGKey(0)
    key, xk = jax.random.split(key)
    x = jax.random.normal(xk, (B, T, input_size), jnp.float32)

    params = init_params(key, input_size, output_size, num_channels, kernel_size)

    out = tcn_model_forward(params, x, kernel_size)
    out = jax.block_until_ready(out)
    assert out.shape == (B, T), out.shape

    # Structural check vs a pure-JAX reference using the same bf16 matmul operands.
    ref_bf16 = reference_forward(params, x, kernel_size, matmul_dtype=jnp.bfloat16)
    err_bf16 = float(jnp.max(jnp.abs(out - ref_bf16)))
    assert jnp.allclose(out, ref_bf16, atol=1e-2, rtol=1e-2), err_bf16

    # Sanity check vs the full-f32 reference (bf16 operand rounding => looser tolerance).
    ref_f32 = reference_forward(params, x, kernel_size, matmul_dtype=jnp.float32)
    err_f32 = float(jnp.max(jnp.abs(out - ref_f32)))
    assert jnp.allclose(out, ref_f32, atol=1e-1, rtol=1e-1), err_f32

    print("KERNEL_OK")
</pallas_src>

<mosaic_0001>
module attributes {stable_mosaic.version = 11 : i64} {
  func.func @_tcn_fused_kernel(%arg0: i32, %arg1: memref<2x16x8xf32, #tpu.memory_space<vmem>>, %arg2: memref<24x16xbf16, #tpu.memory_space<vmem>>, %arg3: memref<48x32xbf16, #tpu.memory_space<vmem>>, %arg4: memref<3x32xf32, #tpu.memory_space<vmem>>, %arg5: memref<1x32xbf16, #tpu.memory_space<vmem>>, %arg6: memref<2x1x16xf32, #tpu.memory_space<vmem>>, %arg7: memref<32x48xf32, #tpu.memory_space<vmem>>, %arg8: memref<32x48xf32, #tpu.memory_space<vmem>>) attributes {dimension_semantics = [#tpu.dimension_semantics<parallel>], iteration_bounds = array<i64: 2>, scalar_prefetch = 0 : i64, scratch_operands = 2 : i64, tpu.core_type = #tpu.core_type<tc>, window_params = [{transform_indices = @transform_0, window_bounds = array<i64: 2, 16, 8>}, {pipeline_mode = #tpu.pipeline_mode<synchronous>, transform_indices = @transform_1, window_bounds = array<i64: 24, 16>}, {pipeline_mode = #tpu.pipeline_mode<synchronous>, transform_indices = @transform_2, window_bounds = array<i64: 48, 32>}, {pipeline_mode = #tpu.pipeline_mode<synchronous>, transform_indices = @transform_3, window_bounds = array<i64: 3, 32>}, {pipeline_mode = #tpu.pipeline_mode<synchronous>, transform_indices = @transform_4, window_bounds = array<i64: 1, 32>}, {transform_indices = @transform_5, window_bounds = array<i64: 2, 1, 16>}]} {
    %c0 = arith.constant 0 : index
    %c0_0 = arith.constant 0 : index
    %c0_1 = arith.constant 0 : index
    %0 = vector.load %arg1[%c0, %c0_0, %c0_1] : memref<2x16x8xf32, #tpu.memory_space<vmem>>, vector<1x16x8xf32>
    %1 = vector.shape_cast %0 : vector<1x16x8xf32> to vector<16x8xf32>
    %cst = arith.constant 0.000000e+00 : f32
    %2 = vector.broadcast %cst : f32 to vector<1x8xf32>
    %c0_2 = arith.constant 0 : index
    %c0_3 = arith.constant 0 : index
    %3 = vector.load %arg7[%c0_2, %c0_3] : memref<32x48xf32, #tpu.memory_space<vmem>>, vector<1x8xf32>
    tpu.vector_store %arg7[%c0_2, %c0_3], %2 {strides = array<i32>} : memref<32x48xf32, #tpu.memory_space<vmem>>, vector<1x8xf32>,
    %4 = vector.extract_strided_slice %1 {offsets = [0, 0], sizes = [15, 8], strides = [1, 1]} : vector<16x8xf32> to vector<15x8xf32>
    %c1 = arith.constant 1 : index
    %c0_4 = arith.constant 0 : index
    %5 = vector.load %arg7[%c1, %c0_4] : memref<32x48xf32, #tpu.memory_space<vmem>>, vector<15x8xf32>
    tpu.vector_store %arg7[%c1, %c0_4], %4 {strides = array<i32>} : memref<32x48xf32, #tpu.memory_space<vmem>>, vector<15x8xf32>,
    %c0_5 = arith.constant 0 : index
    %c8 = arith.constant 8 : index
    %6 = vector.load %arg7[%c0_5, %c8] : memref<32x48xf32, #tpu.memory_space<vmem>>, vector<16x8xf32>
    tpu.vector_store %arg7[%c0_5, %c8], %1 {strides = array<i32>} : memref<32x48xf32, #tpu.memory_space<vmem>>, vector<16x8xf32>,
    %cst_6 = arith.constant 0.000000e+00 : f32
    %7 = vector.broadcast %cst_6 : f32 to vector<1x8xf32>
    %c15 = arith.constant 15 : index
    %c16 = arith.constant 16 : index
    %8 = vector.load %arg7[%c15, %c16] : memref<32x48xf32, #tpu.memory_space<vmem>>, vector<1x8xf32>
    tpu.vector_store %arg7[%c15, %c16], %7 {strides = array<i32>} : memref<32x48xf32, #tpu.memory_space<vmem>>, vector<1x8xf32>,
    %9 = vector.extract_strided_slice %1 {offsets = [1, 0], sizes = [15, 8], strides = [1, 1]} : vector<16x8xf32> to vector<15x8xf32>
    %c0_7 = arith.constant 0 : index
    %c16_8 = arith.constant 16 : index
    %10 = vector.load %arg7[%c0_7, %c16_8] : memref<32x48xf32, #tpu.memory_space<vmem>>, vector<15x8xf32>
    tpu.vector_store %arg7[%c0_7, %c16_8], %9 {strides = array<i32>} : memref<32x48xf32, #tpu.memory_space<vmem>>, vector<15x8xf32>,
    %c1_9 = arith.constant 1 : index
    %c0_10 = arith.constant 0 : index
    %c0_11 = arith.constant 0 : index
    %11 = vector.load %arg1[%c1_9, %c0_10, %c0_11] : memref<2x16x8xf32, #tpu.memory_space<vmem>>, vector<1x16x8xf32>
    %12 = vector.shape_cast %11 : vector<1x16x8xf32> to vector<16x8xf32>
    %cst_12 = arith.constant 0.000000e+00 : f32
    %13 = vector.broadcast %cst_12 : f32 to vector<1x8xf32>
    %c16_13 = arith.constant 16 : index
    %c0_14 = arith.constant 0 : index
    %14 = vector.load %arg7[%c16_13, %c0_14] : memref<32x48xf32, #tpu.memory_space<vmem>>, vector<1x8xf32>
    tpu.vector_store %arg7[%c16_13, %c0_14], %13 {strides = array<i32>} : memref<32x48xf32, #tpu.memory_space<vmem>>, vector<1x8xf32>,
    %15 = vector.extract_strided_slice %12 {offsets = [0, 0], sizes = [15, 8], strides = [1, 1]} : vector<16x8xf32> to vector<15x8xf32>
    %c17 = arith.constant 17 : index
    %c0_15 = arith.constant 0 : index
    %16 = vector.load %arg7[%c17, %c0_15] : memref<32x48xf32, #tpu.memory_space<vmem>>, vector<15x8xf32>
    tpu.vector_store %arg7[%c17, %c0_15], %15 {strides = array<i32>} : memref<32x48xf32, #tpu.memory_space<vmem>>, vector<15x8xf32>,
    %c16_16 = arith.constant 16 : index
    %c8_17 = arith.constant 8 : index
    %17 = vector.load %arg7[%c16_16, %c8_17] : memref<32x48xf32, #tpu.memory_space<vmem>>, vector<16x8xf32>
    tpu.vector_store %arg7[%c16_16, %c8_17], %12 {strides = array<i32>} : memref<32x48xf32, #tpu.memory_space<vmem>>, vector<16x8xf32>,
    %cst_18 = arith.constant 0.000000e+00 : f32
    %18 = vector.broadcast %cst_18 : f32 to vector<1x8xf32>
    %c31 = arith.constant 31 : index
    %c16_19 = arith.constant 16 : index
    %19 = vector.load %arg7[%c31, %c16_19] : memref<32x48xf32, #tpu.memory_space<vmem>>, vector<1x8xf32>
    tpu.vector_store %arg7[%c31, %c16_19], %18 {strides = array<i32>} : memref<32x48xf32, #tpu.memory_space<vmem>>, vector<1x8xf32>,
    %20 = vector.extract_strided_slice %12 {offsets = [1, 0], sizes = [15, 8], strides = [1, 1]} : vector<16x8xf32> to vector<15x8xf32>
    %c16_20 = arith.constant 16 : index
    %c16_21 = arith.constant 16 : index
    %21 = vector.load %arg7[%c16_20, %c16_21] : memref<32x48xf32, #tpu.memory_space<vmem>>, vector<15x8xf32>
    tpu.vector_store %arg7[%c16_20, %c16_21], %20 {strides = array<i32>} : memref<32x48xf32, #tpu.memory_space<vmem>>, vector<15x8xf32>,
    %c0_22 = arith.constant 0 : index
    %c0_23 = arith.constant 0 : index
    %22 = vector.load %arg7[%c0_22, %c0_23] : memref<32x48xf32, #tpu.memory_space<vmem>>, vector<32x24xf32>
    %23 = arith.truncf %22 : vector<32x24xf32> to vector<32x24xbf16>
    %c0_24 = arith.constant 0 : index
    %c0_25 = arith.constant 0 : index
    %24 = vector.load %arg2[%c0_24, %c0_25] : memref<24x16xbf16, #tpu.memory_space<vmem>>, vector<24x16xbf16>
    %cst_26 = arith.constant dense<0.000000e+00> : vector<32x16xf32>
    %25 = tpu.matmul %23, %24, %cst_26 {dimension_numbers = #tpu.dot_dimension_numbers<[1], [0], [0], [1], [0, 0, 1, 1], [], []>} : vector<32x24xbf16>, vector<24x16xbf16>, vector<32x16xf32> -> vector<32x16xf32>
    %c0_27 = arith.constant 0 : index
    %c0_28 = arith.constant 0 : index
    %26 = vector.load %arg4[%c0_27, %c0_28] : memref<3x32xf32, #tpu.memory_space<vmem>>, vector<1x16xf32>
    %27 = vector.broadcast %26 : vector<1x16xf32> to vector<32x16xf32>
    %28 = arith.addf %25, %27 : vector<32x16xf32>
    %cst_29 = arith.constant 0.000000e+00 : f32
    %29 = vector.broadcast %cst_29 : f32 to vector<32x16xf32>
    %30 = arith.maximumf %28, %29 : vector<32x16xf32>
    %31 = vector.extract_strided_slice %30 {offsets = [0, 0], sizes = [16, 16], strides = [1, 1]} : vector<32x16xf32> to vector<16x16xf32>
    %cst_30 = arith.constant 0.000000e+00 : f32
    %32 = vector.broadcast %cst_30 : f32 to vector<2x16xf32>
    %c0_31 = arith.constant 0 : index
    %c0_32 = arith.constant 0 : index
    %33 = vector.load %arg8[%c0_31, %c0_32] : memref<32x48xf32, #tpu.memory_space<vmem>>, vector<2x16xf32>
    tpu.vector_store %arg8[%c0_31, %c0_32], %32 {strides = array<i32>} : memref<32x48xf32, #tpu.memory_space<vmem>>, vector<2x16xf32>,
    %34 = vector.extract_strided_slice %31 {offsets = [0, 0], sizes = [14, 16], strides = [1, 1]} : vector<16x16xf32> to vector<14x16xf32>
    %c2 = arith.constant 2 : index
    %c0_33 = arith.constant 0 : index
    %35 = vector.load %arg8[%c2, %c0_33] : memref<32x48xf32, #tpu.memory_space<vmem>>, vector<14x16xf32>
    tpu.vector_store %arg8[%c2, %c0_33], %34 {strides = array<i32>} : memref<32x48xf32, #tpu.memory_space<vmem>>, vector<14x16xf32>,
    %c0_34 = arith.constant 0 : index
    %c16_35 = arith.constant 16 : index
    %36 = vector.load %arg8[%c0_34, %c16_35] : memref<32x48xf32, #tpu.memory_space<vmem>>, vector<16x16xf32>
    tpu.vector_store %arg8[%c0_34, %c16_35], %31 {strides = array<i32>} : memref<32x48xf32, #tpu.memory_space<vmem>>, vector<16x16xf32>,
    %cst_36 = arith.constant 0.000000e+00 : f32
    %37 = vector.broadcast %cst_36 : f32 to vector<2x16xf32>
    %c14 = arith.constant 14 : index
    %c32 = arith.constant 32 : index
    %38 = vector.load %arg8[%c14, %c32] : memref<32x48xf32, #tpu.memory_space<vmem>>, vector<2x16xf32>
    tpu.vector_store %arg8[%c14, %c32], %37 {strides = array<i32>} : memref<32x48xf32, #tpu.memory_space<vmem>>, vector<2x16xf32>,
    %39 = vector.extract_strided_slice %31 {offsets = [2, 0], sizes = [14, 16], strides = [1, 1]} : vector<16x16xf32> to vector<14x16xf32>
    %c0_37 = arith.constant 0 : index
    %c32_38 = arith.constant 32 : index
    %40 = vector.load %arg8[%c0_37, %c32_38] : memref<32x48xf32, #tpu.memory_space<vmem>>, vector<14x16xf32>
    tpu.vector_store %arg8[%c0_37, %c32_38], %39 {strides = array<i32>} : memref<32x48xf32, #tpu.memory_space<vmem>>, vector<14x16xf32>,
    %41 = vector.extract_strided_slice %30 {offsets = [16, 0], sizes = [16, 16], strides = [1, 1]} : vector<32x16xf32> to vector<16x16xf32>
    %cst_39 = arith.constant 0.000000e+00 : f32
    %42 = vector.broadcast %cst_39 : f32 to vector<2x16xf32>
    %c16_40 = arith.constant 16 : index
    %c0_41 = arith.constant 0 : index
    %43 = vector.load %arg8[%c16_40, %c0_41] : memref<32x48xf32, #tpu.memory_space<vmem>>, vector<2x16xf32>
    tpu.vector_store %arg8[%c16_40, %c0_41], %42 {strides = array<i32>} : memref<32x48xf32, #tpu.memory_space<vmem>>, vector<2x16xf32>,
    %44 = vector.extract_strided_slice %41 {offsets = [0, 0], sizes = [14, 16], strides = [1, 1]} : vector<16x16xf32> to vector<14x16xf32>
    %c18 = arith.constant 18 : index
    %c0_42 = arith.constant 0 : index
    %45 = vector.load %arg8[%c18, %c0_42] : memref<32x48xf32, #tpu.memory_space<vmem>>, vector<14x16xf32>
    tpu.vector_store %arg8[%c18, %c0_42], %44 {strides = array<i32>} : memref<32x48xf32, #tpu.memory_space<vmem>>, vector<14x16xf32>,
    %c16_43 = arith.constant 16 : index
    %c16_44 = arith.constant 16 : index
    %46 = vector.load %arg8[%c16_43, %c16_44] : memref<32x48xf32, #tpu.memory_space<vmem>>, vector<16x16xf32>
    tpu.vector_store %arg8[%c16_43, %c16_44], %41 {strides = array<i32>} : memref<32x48xf32, #tpu.memory_space<vmem>>, vector<16x16xf32>,
    %cst_45 = arith.constant 0.000000e+00 : f32
    %47 = vector.broadcast %cst_45 : f32 to vector<2x16xf32>
    %c30 = arith.constant 30 : index
    %c32_46 = arith.constant 32 : index
    %48 = vector.load %arg8[%c30, %c32_46] : memref<32x48xf32, #tpu.memory_space<vmem>>, vector<2x16xf32>
    tpu.vector_store %arg8[%c30, %c32_46], %47 {strides = array<i32>} : memref<32x48xf32, #tpu.memory_space<vmem>>, vector<2x16xf32>,
    %49 = vector.extract_strided_slice %41 {offsets = [2, 0], sizes = [14, 16], strides = [1, 1]} : vector<16x16xf32> to vector<14x16xf32>
    %c16_47 = arith.constant 16 : index
    %c32_48 = arith.constant 32 : index
    %50 = vector.load %arg8[%c16_47, %c32_48] : memref<32x48xf32, #tpu.memory_space<vmem>>, vector<14x16xf32>
    tpu.vector_store %arg8[%c16_47, %c32_48], %49 {strides = array<i32>} : memref<32x48xf32, #tpu.memory_space<vmem>>, vector<14x16xf32>,
    %c0_49 = arith.constant 0 : index
    %c0_50 = arith.constant 0 : index
    %51 = vector.load %arg8[%c0_49, %c0_50] : memref<32x48xf32, #tpu.memory_space<vmem>>, vector<32x48xf32>
    %52 = arith.truncf %51 : vector<32x48xf32> to vector<32x48xbf16>
    %c0_51 = arith.constant 0 : index
    %c0_52 = arith.constant 0 : index
    %53 = vector.load %arg3[%c0_51, %c0_52] : memref<48x32xbf16, #tpu.memory_space<vmem>>, vector<48x32xbf16>
    %cst_53 = arith.constant dense<0.000000e+00> : vector<32x32xf32>
    %54 = tpu.matmul %52, %53, %cst_53 {dimension_numbers = #tpu.dot_dimension_numbers<[1], [0], [0], [1], [0, 0, 1, 1], [], []>} : vector<32x48xbf16>, vector<48x32xbf16>, vector<32x32xf32> -> vector<32x32xf32>
    %c1_54 = arith.constant 1 : index
    %c0_55 = arith.constant 0 : index
    %55 = vector.load %arg4[%c1_54, %c0_55] : memref<3x32xf32, #tpu.memory_space<vmem>>, vector<1x32xf32>
    %56 = vector.broadcast %55 : vector<1x32xf32> to vector<32x32xf32>
    %57 = arith.addf %54, %56 : vector<32x32xf32>
    %cst_56 = arith.constant 0.000000e+00 : f32
    %58 = vector.broadcast %cst_56 : f32 to vector<32x32xf32>
    %59 = arith.maximumf %57, %58 : vector<32x32xf32>
    %c0_57 = arith.constant 0 : index
    %c0_58 = arith.constant 0 : index
    %60 = vector.load %arg5[%c0_57, %c0_58] : memref<1x32xbf16, #tpu.memory_space<vmem>>, vector<1x32xbf16>
    %61 = vector.extract_strided_slice %59 {offsets = [0, 0], sizes = [16, 32], strides = [1, 1]} : vector<32x32xf32> to vector<16x32xf32>
    %62 = arith.truncf %61 : vector<16x32xf32> to vector<16x32xbf16>
    %cst_59 = arith.constant dense<0.000000e+00> : vector<1x16xf32>
    %63 = tpu.matmul %60, %62, %cst_59 {dimension_numbers = #tpu.dot_dimension_numbers<[1], [1], [0], [0], [0, 0, 1, 0], [], []>} : vector<1x32xbf16>, vector<16x32xbf16>, vector<1x16xf32> -> vector<1x16xf32>
    %64 = vector.extract_strided_slice %59 {offsets = [16, 0], sizes = [16, 32], strides = [1, 1]} : vector<32x32xf32> to vector<16x32xf32>
    %65 = arith.truncf %64 : vector<16x32xf32> to vector<16x32xbf16>
    %cst_60 = arith.constant dense<0.000000e+00> : vector<1x16xf32>
    %66 = tpu.matmul %60, %65, %cst_60 {dimension_numbers = #tpu.dot_dimension_numbers<[1], [1], [0], [0], [0, 0, 1, 0], [], []>} : vector<1x32xbf16>, vector<16x32xbf16>, vector<1x16xf32> -> vector<1x16xf32>
    %67 = tpu.concatenate %63, %66 in 0 : vector<1x16xf32>, vector<1x16xf32> -> vector<2x16xf32>
    %c2_61 = arith.constant 2 : index
    %c0_62 = arith.constant 0 : index
    %68 = vector.load %arg4[%c2_61, %c0_62] : memref<3x32xf32, #tpu.memory_space<vmem>>, vector<1x1xf32>
    %69 = vector.broadcast %68 : vector<1x1xf32> to vector<2x16xf32>
    %70 = arith.addf %67, %69 : vector<2x16xf32>
    %71 = vector.shape_cast %70 : vector<2x16xf32> to vector<2x1x16xf32>
    %c0_63 = arith.constant 0 : index
    %c0_64 = arith.constant 0 : index
    %c0_65 = arith.constant 0 : index
    %72 = vector.load %arg6[%c0_63, %c0_64, %c0_65] : memref<2x1x16xf32, #tpu.memory_space<vmem>>, vector<2x1x16xf32>
    tpu.vector_store %arg6[%c0_63, %c0_64, %c0_65], %71 {strides = array<i32>} : memref<2x1x16xf32, #tpu.memory_space<vmem>>, vector<2x1x16xf32>,
    return
  }
  func.func @transform_0(%arg0: i32) -> (i32, i32, i32) {
    %c0_i32 = arith.constant 0 : i32
    %c0_i32_0 = arith.constant 0 : i32
    %c0_i32_1 = arith.constant 0 : i32
    return %arg0, %c0_i32, %c0_i32_0 : i32, i32, i32
  }
  func.func @transform_1(%arg0: i32) -> (i32, i32) {
    %c0_i32 = arith.constant 0 : i32
    %c0_i32_0 = arith.constant 0 : i32
    %c0_i32_1 = arith.constant 0 : i32
    return %c0_i32, %c0_i32_0 : i32, i32
  }
  func.func @transform_2(%arg0: i32) -> (i32, i32) {
    %c0_i32 = arith.constant 0 : i32
    %c0_i32_0 = arith.constant 0 : i32
    %c0_i32_1 = arith.constant 0 : i32
    return %c0_i32, %c0_i32_0 : i32, i32
  }
  func.func @transform_3(%arg0: i32) -> (i32, i32) {
    %c0_i32 = arith.constant 0 : i32
    %c0_i32_0 = arith.constant 0 : i32
    %c0_i32_1 = arith.constant 0 : i32
    return %c0_i32, %c0_i32_0 : i32, i32
  }
  func.func @transform_4(%arg0: i32) -> (i32, i32) {
    %c0_i32 = arith.constant 0 : i32
    %c0_i32_0 = arith.constant 0 : i32
    %c0_i32_1 = arith.constant 0 : i32
    return %c0_i32, %c0_i32_0 : i32, i32
  }
  func.func @transform_5(%arg0: i32) -> (i32, i32, i32) {
    %c0_i32 = arith.constant 0 : i32
    %c0_i32_0 = arith.constant 0 : i32
    %c0_i32_1 = arith.constant 0 : i32
    return %arg0, %c0_i32, %c0_i32_0 : i32, i32, i32
  }
}

</mosaic_0001>

<bundles_post_ra>
// kernel: tpu_custom_call.1
= control target key start
LH: loop header
LB: loop body
LE: loop exit
PB: predicated region body
PF: predicated region fallthrough
CT: control target
= control target key end

     0   :  { %10 = vsyncpa [#allocation5], 0  ;;  %s1117_s0 = inlined_call_operand.vmem [shape: f32[4,16,8], index: 0, kind: input, shape index: {}]   ;;  %s1118_s1 = inlined_call_operand.vmem [shape: bf16[24,16], index: 1, kind: input, shape index: {}]   ;;  %s1119_s2 = inlined_call_operand.vmem [shape: bf16[48,32], index: 2, kind: input, shape index: {}]   ;;  %s1120_s3 = inlined_call_operand.vmem [shape: f32[3,32], index: 3, kind: input, shape index: {}]   ;;  %s1121_s4 = inlined_call_operand.vmem [shape: bf16[1,32], index: 4, kind: input, shape index: {}]   ;;  %s1122_s5 = inlined_call_operand.hbm [shape: f32[4,1,16], index: 5, kind: output, shape index: {}]  }
   0x1   :  { %12 = vsyncpa [#allocation5 + $0x1], 0  ;;  %s956_s18 = smov 0   ;;  %s958_s19 = smov 0  }
   0x2   :  { %s960_s20 = smov 0   ;;  %s962_s21 = smov 0  }
   0x3 LB: > { %s977_s22 = sadd.s32 4294967295, %s916_s21   ;;  %s727_s23 = sadd.s32 4294967294, %s916_s21   ;;  %s916_s21 = sphi %s962_s21, %s1128_s21   ;;  %s912_s20 = sphi %s960_s20, %s1127_s20   ;;  %s908_s19 = sphi %s958_s19, %s1126_s19   ;;  %s904_s18 = sphi %s956_s18, %s1125_s18  }
   0x4   : > { %s981_s24 = sadd.s32 1, %s916_s21   ;;  %s135_s25 = sadd.s32 1, %s912_s20 }
   0x5   : > { %s132_s26 = ssub.s32 %s916_s21, %s981_s24  ;;  %p145_p0 = scmp.ne.s32.totalorder %s912_s20, %s908_s19 }
   0x6   : > { %p133_p1 = scmp.eq.s32.totalorder %s132_s26, 0  ;;  %p146_p2 = scmp.eq.s32.totalorder %s977_s22, 1 }
   0x7   : > { %p151_p3 = scmp.ne.s32.totalorder %s908_s19, %s904_s18  ;;  %p152_p4 = scmp.eq.s32.totalorder %s727_s23, 1 }
   0x8   : > { %s992_s27 = scalar_select %p133_p1, %s912_s20, %s135_s25  }
   0x9   : > { %p994_p5 = por %p146_p2, %p145_p0  ;;  %p998_p6 = por %p152_p4, %p151_p3 }
   0xa   : > { %p730_p7 = scmp.ge.s32.totalorder %s916_s21, 1  ;;  %p192_p8 = scmp.lt.s32.totalorder %s916_s21, 3 }
   0xc   : > { %p193_p9 = pnand %p730_p7, %p192_p8 }
   0xd   : > { %s732_s30 = sshll.u32 (!%p193_p9), %s977_s22, 1  ;;  %vm232_vm0 = vcmask (!%p193_p9), 57344   ;;  %v918_v0 = vmov (!%p193_p9), 0.0   ;;  %vm234_vm1 = vcmask (!%p193_p9), 64512   ;;  %vm236_vm2 = vcmask (!%p193_p9), 63488   ;;  %s919_s10 = smov (!%p193_p9), 16  }
   0xe   : > { %196 = sbr.rel (%p193_p9) target bundleno = 984 (0x3d8), region = 40  ;;  %p222_p10 = scmp.lt.s32.totalorder (!%p193_p9), %s732_s30, 3  ;;  %233 = vst.msk [vmem:[#allocation2] sm:$0x1] (!%p193_p9), %vm232_vm0, %v918_v0  ;;  %264 = vst.msk [vmem:[#allocation2 + $0x10] sm:$0x1] (!%p193_p9), %vm232_vm0, %v918_v0 }
   0xf   : > { %s920_s11 = smov (!%p193_p9), 8   ;;  %v849_v5 = vld [vmem:[%s1118_s1] sm:$0xff] (!%p193_p9)   ;;  %v850_v6 = vld [vmem:[%s1118_s1 + $0x8] ss:$0 sps:$4 sm:$0xff] (!%p193_p9)   ;;  %vm316_vm3 = vcmask (!%p193_p9), 1043456   ;;  %vm246_vm4 = vcmask (!%p193_p9), 130112  }
  0x10   : > { %770 = vmatprep.subr.bf16.mxu0 (!%p193_p9), %v849_v5  ;;  %v318_v7 = vsel (!%p193_p9), %vm316_vm3, %v850_v6, 0  ;;  %vm257_vm5 = vcmask (!%p193_p9), 195713   ;;  %vm249_vm6 = vcmask (!%p193_p9), 188544   ;;  %vm259_vm7 = vcmask (!%p193_p9), 195712   ;;  %v737_v22 = vld [vmem:[%s1120_s3] ss:$0 sm:$0xff] (!%p193_p9) }
  0x11   : > { %771 = vmatpush3.bf16.msra.mxu0 (!%p193_p9), %v849_v5  ;;  %vm309_vm8 = vcmask (!%p193_p9), 195584   ;;  %vm373_vm9 = vcmask (!%p193_p9), 123904   ;;  %vm375_vm10 = vcmask (!%p193_p9), 130048   ;;  %v851_v28 = vld [vmem:[%s1119_s2] sm:$0xff] (!%p193_p9)   ;;  %vm377_vm11 = vcmask (!%p193_p9), 128000   ;;  %v852_v36 = vld [vmem:[%s1119_s2 + $0x8] sm:$0xff] (!%p193_p9)  }
  0x12   : > { %800 = vmatprep.subr.msk.bf16.mxu0 (!%p193_p9), %vm316_vm3, %v850_v6  ;;  %402 = vst.msk [vmem:[#allocation3 + $0x10] sm:$0x3] (!%p193_p9), %vm373_vm9, %v918_v0  ;;  %374 = vst.msk [vmem:[#allocation3] sm:$0x3] (!%p193_p9), %vm373_vm9, %v918_v0  ;;  %778 = vmatprep.subr.bf16.mxu1 (!%p193_p9), %v851_v28  ;;  %v853_v37 = vld [vmem:[%s1119_s2 + $0x10] sm:$0xff] (!%p193_p9)   ;;  %s921_s8 = smov (!%p193_p9), 32  }
  0x13   : > { %779 = vmatpush3.bf16.msra.mxu1 (!%p193_p9), %v851_v28  ;;  %vm387_vm12 = vcmask (!%p193_p9), 261248   ;;  %vm390_vm13 = vcmask (!%p193_p9), 386304   ;;  %vm398_vm14 = vcmask (!%p193_p9), 392450   ;;  %vm400_vm15 = vcmask (!%p193_p9), 392448   ;;  %v617_v52 = vld [vmem:[%s1120_s3 + $0x2] sm:$0x1] (!%p193_p9) }
  0x14   : > { %780 = vmatprep.subr.bf16.mxu1 (!%p193_p9), %v852_v36  ;;  %vm459_vm0 = vcmask (!%p193_p9), 392192   ;;  %801 = vpush (!%p193_p9), %v617_v52  ;;  %v742_v53 = vld [vmem:[%s1120_s3 + $0x1] ss:$0 sm:$0xff] (!%p193_p9)  ;;  %v519_v6 = vld [vmem:[%s1121_s4] sm:$0x1] (!%p193_p9)  ;;  %s218_s16 = sand.u32 (!%p193_p9), 1, %s908_s19  }
  0x15   : > { %s1130_s30 = smov (!%p222_p10, %s732_s30), 3  ;;  %773 = vmatpush3.bf16.msra.mxu0 %v318_v7  ;;  %v923_v7 = vmov 1966171168   ;;  %vm615_vm3 = vcmask 1040384   ;;  %s731_s23 = sshll.u32 %s218_s16, 1 }
  0x16   : > { %s755_s6 = sshll.u32 %s1130_s30, 4  ;;  %788 = vmatprep.subr.bf16.mxu0 %v918_v0  ;;  %s756_s25 = sshll.u32 %s977_s22, 5 }
  0x17   : > { %s226_s9 = scalar_lea.vmem %s1117_s0, %s755_s6  ;;  %781 = vmatpush3.bf16.msra.mxu1 %v852_v36  ;;  %s220_s26 = scalar_lea.vmem [#allocation4], %s731_s23 }
  0x18   : > { %v230_v1 = vld [vmem:[%s226_s9] sm:$0xff]  ;;  %v231_v2 = vld [vmem:[%s226_s9 + $0x8] sm:$0xff]  ;;  %v736_v3 = vld [vmem:[%s226_s9 + $0x18] sm:$0xff]  ;;  %782 = vmatprep.subr.bf16.mxu1 %v853_v37  ;;  %s665_s30 = sshll.u32 %s220_s26, 4  ;;  %s1074_s22 = scalar_lea.sflag [#allocation5], %s218_s16  ;;  %s1070_s30 = int_to_ptr.vmem [resolvable:$true] %s665_s30 }
  0x19   : > { %251 = vrot.lane.b32.xlu1 %v230_v1, %s919_s10  ;;  %235 = vst.msk [vmem:[#allocation2 + $0x1] sm:$0xff] %vm234_vm1, %v230_v1  ;;  %240 = vrot.lane.b32.xlu0 %v230_v1, %s920_s11  ;;  %v735_v4 = vld [vmem:[%s226_s9 + $0x10] sm:$0xff]  ;;  %s854_s9 = scalar_lea.vmem %s1070_s30, 32 }
  0x1a   : > { %237 = vst.msk [vmem:[#allocation2 + $0x9] sm:$0x7f] %vm236_vm2, %v231_v2  ;;  %266 = vst.msk [vmem:[#allocation2 + $0x19] sm:$0x7f] %vm236_vm2, %v736_v3  ;;  %vm521_vm2 = vcmask 261120   ;;  %p855_p11 = scmp.ne.s32.totalorder %s1070_s30, %s854_s9 }
  0x1b   : > { %265 = vst.msk [vmem:[#allocation2 + $0x11] sm:$0xff] %vm234_vm1, %v735_v4  ;;  %783 = vmatpush3.bf16.msra.mxu1 %v853_v37  ;;  %vm922_vm1 = vmmov 0  }
  0x1c   : > { %794 = vmatprep.subr.bf16.mxu1 %v918_v0  ;;  %p856_p12 = pnand %p855_p11, %p994_p5 }
  0x1d   : > { %253 = vrot.lane.b32.xlu1 %v231_v2, %s919_s10  ;;  %242 = vrot.lane.b32.xlu0 %v231_v2, %s920_s11 }
  0x1e   : > { %p857_p13 = pneg %p856_p12 }
  0x21   : > { %271 = vrot.lane.b32.xlu1 %v736_v3, %s920_s11  ;;  %269 = vrot.lane.b32.xlu0 %v735_v4, %s920_s11  ;;  %s924_s11 = smov [#allocation4]  }
  0x22   : > { %s858_s12 = sshll.u32 %s924_s11, 4  ;;  %s859_s12 = int_to_ptr.vmem [resolvable:$false] %s858_s12 }
  0x23   : > { %s860_s13 = scalar_lea.vmem %s859_s12, 64  ;;  %p861_p0 = scmp.lt.s32.totalorder %s1070_s30, %s859_s12 }
  0x24   : > { %p862_p1 = scmp.lt.s32.totalorder %s860_s13, %s854_s9 }
  0x25   : > { %280 = vrot.lane.b32.xlu1 %v736_v3, %s919_s10  ;;  %278 = vrot.lane.b32.xlu0 %v735_v4, %s919_s10 }
  0x26   : > { %p863_p2 = por %p862_p1, %p861_p0 }
  0x28   : > { %p864_p3 = pnand %p863_p2, %p857_p13 }
  0x45   : > { %s802_s17 = spop %801 }
  0x8b   : > { %v252_v8 = vpop.permute.xlu1 %251  ;;  %v241_v9 = vpop.permute.xlu0 %240 }
  0x8c   : > { %247 = vst.msk [vmem:[#allocation2] sm:$0xff] %vm246_vm4, %v241_v9  ;;  %v627_v9 = vlaneseq }
  0x8d   : > { %258 = vst.msk [vmem:[#allocation2 - $0x1] sm:$0xfe] %vm257_vm5, %v252_v8  ;;  %v625_v8 = vunpack.c.l.s4 %v923_v7 }
  0x8f   : > { %v254_v10 = vpop.permute.xlu1 %253  ;;  %v243_v11 = vpop.permute.xlu0 %242 }
  0x90   : > { %248 = vst.msk [vmem:[#allocation2 + $0x8] sm:$0xff] %vm246_vm4, %v243_v11  ;;  %v628_v11 = vshrl.u32 %v627_v9, 7 }
  0x91   : > { %250 = vst.msk [vmem:[#allocation2 + $0xf] sm:$0x1] %vm249_vm6, %v918_v0 }
  0x92   : > { %260 = vst.msk [vmem:[#allocation2 + $0x7] sm:$0xff] %vm259_vm7, %v254_v10  ;;  %v626_v10 = vunpack.c.0.s8 %v625_v8 }
  0x93   : > { %v272_v12 = vpop.permute.xlu1 %271  ;;  %v270_v13 = vpop.permute.xlu0 %269 }
  0x94   : > { %276 = vst.msk [vmem:[#allocation2 + $0x18] sm:$0xff] %vm246_vm4, %v272_v12  ;;  %275 = vst.msk [vmem:[#allocation2 + $0x10] sm:$0xff] %vm246_vm4, %v270_v13  ;;  %vm648_vm4 = vcmask 122880  }
  0x95   : > { %277 = vst.msk [vmem:[#allocation2 + $0x1f] sm:$0x1] %vm249_vm6, %v918_v0 }
  0x97   : > { %v281_v14 = vpop.permute.xlu1 %280  ;;  %v279_v15 = vpop.permute.xlu0 %278 }
  0x98   : > { %285 = vst.msk [vmem:[#allocation2 + $0x17] sm:$0xff] %vm259_vm7, %v281_v14 }
  0x99   : > { %284 = vst.msk [vmem:[#allocation2 + $0xf] sm:$0xfe] %vm257_vm5, %v279_v15  ;;  %v286_v16 = vld [vmem:[#allocation2] sm:$0xff]  ;;  %v287_v17 = vld [vmem:[#allocation2 + $0x8] sm:$0xff] }
  0x9a   : > { %v290_v18 = vpack.c.bf16 %v287_v17, %v286_v16  ;;  %v620_v16 = vstv %s802_s17 }
  0x9c   : > { %774 = vmatprep.mubr.msk.bf16.mxu0 %vm309_vm8, %v290_v18 }
  0x9f   : > { %v289_v20 = vld [vmem:[#allocation2 + $0x18] sm:$0xff] }
  0xa0   : > { %v288_v19 = vld [vmem:[#allocation2 + $0x10] sm:$0xff] }
  0xa1   : > { %v291_v21 = vpack.c.bf16 %v289_v20, %v288_v19  ;;  %v629_v19 = vsub.s32 %v626_v10, %v628_v11 }
  0xa3   : > { %775 = vmatmul.mubr.msk.bf16.vlgmr.msra.gmra.mrb[0].mxu0 %vm309_vm8, %v291_v21 }
  0xa4   : > { %790 = vmatprep.mubr.msk.bf16.mxu0 %vm922_vm1, %v918_v0 }
 0x176   : > { %v776_v23 = vpop.f32.mrb[0].mxu0 }
 0x177   : > { %v363_v24 = vadd.f32 %v776_v23, %v737_v22  ;;  %v354_v25 = vpop.f32.mrb[1].mxu0 }
 0x178   : > { %v355_v26 = vadd.f32 %v737_v22, %v354_v25  ;;  %v777_v27 = vpop.f32.mrb[2].mxu0 }
 0x179   : > { %v371_v29 = vmax.f32 %v363_v24, 0.0  ;;  %v366_v30 = vadd.f32 %v777_v27, %v737_v22  ;;  %v357_v31 = vpop.f32.mrb[3].mxu0 }
 0x17a   : > { %v369_v32 = vmax.f32 %v355_v26, 0.0  ;;  %v358_v33 = vadd.f32 %v737_v22, %v357_v31 }
 0x17b   : > { %403 = vst.msk [vmem:[#allocation3 + $0x12] sm:$0xff] %vm375_vm10, %v371_v29  ;;  %v372_v34 = vmax.f32 %v366_v30, 0.0  ;;  %407 = vrot.lane.b32.xlu0 %v371_v29, %s919_s10 }
 0x17c   : > { %376 = vst.msk [vmem:[#allocation3 + $0x2] sm:$0xff] %vm375_vm10, %v369_v32  ;;  %v370_v35 = vmax.f32 %v358_v33, 0.0 }
 0x17d   : > { %404 = vst.msk [vmem:[#allocation3 + $0x1a] sm:$0x3f] %vm377_vm11, %v372_v34  ;;  %409 = vrot.lane.b32.xlu1 %v372_v34, %s919_s10 }
 0x17e   : > { %378 = vst.msk [vmem:[#allocation3 + $0xa] sm:$0x3f] %vm377_vm11, %v370_v35 }
 0x17f   : > { %381 = vrot.lane.b32.xlu0 %v369_v32, %s919_s10 }
 0x181   : > { %383 = vrot.lane.b32.xlu1 %v370_v35, %s919_s10 }
 0x183   : > { %392 = vrot.lane.b32.xlu0 %v369_v32, %s921_s8 }
 0x185   : > { %394 = vrot.lane.b32.xlu1 %v370_v35, %s921_s8 }
 0x187   : > { %416 = vrot.lane.b32.xlu0 %v371_v29, %s921_s8 }
 0x189   : > { %418 = vrot.lane.b32.xlu1 %v372_v34, %s921_s8  ;;  %s1068_s8 = scalar_lea.hbm %s1122_s5, %s756_s25 }
 0x1ed   : > { %v408_v38 = vpop.permute.xlu0 %407 }
 0x1ee   : > { %413 = vst.msk [vmem:[#allocation3 + $0x10] sm:$0xff] %vm387_vm12, %v408_v38 }
 0x1ef   : > { %v410_v39 = vpop.permute.xlu1 %409 }
 0x1f0   : > { %414 = vst.msk [vmem:[#allocation3 + $0x18] sm:$0xff] %vm387_vm12, %v410_v39 }
 0x1f1   : > { %415 = vst.msk [vmem:[#allocation3 + $0x1e] sm:$0x3] %vm390_vm13, %v918_v0  ;;  %v382_v40 = vpop.permute.xlu0 %381 }
 0x1f2   : > { %388 = vst.msk [vmem:[#allocation3] sm:$0xff] %vm387_vm12, %v382_v40 }
 0x1f3   : > { %v384_v41 = vpop.permute.xlu1 %383 }
 0x1f4   : > { %389 = vst.msk [vmem:[#allocation3 + $0x8] sm:$0xff] %vm387_vm12, %v384_v41 }
 0x1f5   : > { %391 = vst.msk [vmem:[#allocation3 + $0xe] sm:$0x3] %vm390_vm13, %v918_v0  ;;  %v393_v42 = vpop.permute.xlu0 %392 }
 0x1f6   : > { %399 = vst.msk [vmem:[#allocation3 - $0x2] sm:$0xfc] %vm398_vm14, %v393_v42 }
 0x1f7   : > { %v395_v43 = vpop.permute.xlu1 %394 }
 0x1f8   : > { %401 = vst.msk [vmem:[#allocation3 + $0x6] sm:$0xff] %vm400_vm15, %v395_v43 }
 0x1f9   : > { %v417_v44 = vpop.permute.xlu0 %416 }
 0x1fa   : > { %422 = vst.msk [vmem:[#allocation3 + $0xe] sm:$0xfc] %vm398_vm14, %v417_v44 }
 0x1fb   : > { %v419_v45 = vpop.permute.xlu1 %418 }
 0x1fc   : > { %423 = vst.msk [vmem:[#allocation3 + $0x16] sm:$0xff] %vm400_vm15, %v419_v45 }
 0x1ff   : > { %v424_v46 = vld [vmem:[#allocation3] sm:$0xff]  ;;  %v425_v47 = vld [vmem:[#allocation3 + $0x8] sm:$0xff] }
 0x200   : > { %v428_v48 = vpack.c.bf16 %v425_v47, %v424_v46 }
 0x202   : > { %784 = vmatprep.mubr.msk.bf16.mxu1 %vm459_vm0, %v428_v48 }
 0x203   : > { %v426_v49 = vld [vmem:[#allocation3 + $0x10] sm:$0xff]  ;;  %v427_v50 = vld [vmem:[#allocation3 + $0x18] sm:$0xff] }
 0x204   : > { %v429_v51 = vpack.c.bf16 %v427_v50, %v426_v49 }
 0x206   : > { %785 = vmatmul.mubr.msk.bf16.vlgmr.msra.gmra.mrb[0].mxu1 %vm459_vm0, %v429_v51 }
 0x207   : > { %796 = vmatprep.mubr.msk.bf16.mxu1 %vm922_vm1, %v918_v0 }
 0x2d9   : > { %v786_v54 = vpop.f32.mrb[0].mxu1 }
 0x2da   : > { %v509_v55 = vadd.f32 %v786_v54, %v742_v53  ;;  %v500_v56 = vpop.f32.mrb[1].mxu1 }
 0x2db   : > { %v501_v57 = vadd.f32 %v742_v53, %v500_v56  ;;  %v787_v58 = vpop.f32.mrb[2].mxu1 }
 0x2dc   : > { %v512_v59 = vadd.f32 %v787_v58, %v742_v53  ;;  %v503_v60 = vpop.f32.mrb[3].mxu1  ;;  %v517_v62 = vmax.f32 %v509_v55, 0.0 }
 0x2dd   : > { %v504_v61 = vadd.f32 %v742_v53, %v503_v60  ;;  %v515_v0 = vmax.f32 %v501_v57, 0.0 }
 0x2de   : > { %v518_v63 = vmax.f32 %v512_v59, 0.0 }
 0x2df   : > { %v516_v1 = vmax.f32 %v504_v61, 0.0 }
 0x2e0   : > { %v568_v2 = vpack.c.bf16 %v518_v63, %v517_v62 }
 0x2e1   : > { %v520_v3 = vpack.c.bf16 %v516_v1, %v515_v0 }
 0x2e2   : > { %v570_v4 = vsel %vm521_vm2, %v568_v2, 0 }
 0x2e3   : > { %795 = vmatpush3.bf16.xpose.msra.mxu1 %v570_v4  ;;  %v526_v5 = vsel %vm521_vm2, %v520_v3, 0 }
 0x2e4   : > { %789 = vmatpush3.bf16.xpose.msra.mxu0 %v526_v5 }
 0x2ea   : > { %797 = vmatmul.mubr.msk.bf16.vlgmr.msra.gmra.mrb[4].mxu1 %vm521_vm2, %v519_v6 }
 0x2eb   : > { %791 = vmatmul.mubr.msk.bf16.vlgmr.msra.gmra.mrb[4].mxu0 %vm521_vm2, %v519_v6 }
 0x3bd   : > { %v606_v12 = vpop.f32.mrb[4].mxu1 }
 0x3be   : > { %v613_v13 = vrot.slane %v606_v12, 7  ;;  %v562_v14 = vpop.f32.mrb[4].mxu0  ;;  %v798_v15 = vpop.f32.mrb[5].mxu1 }
 0x3bf   : > { %v792_v17 = vpop.f32.mrb[5].mxu0  ;;  %v609_v18 = vpop.f32.mrb[6].mxu1 }
 0x3c0   : > { %v565_v20 = vpop.f32.mrb[6].mxu0  ;;  %v799_v21 = vpop.f32.mrb[7].mxu1  ;;  %v616_v22 = vsel %vm615_vm3, %v562_v14, %v613_v13 }
 0x3c1   : > { %v622_v23 = vadd.f32 %v620_v16, %v616_v22  ;;  %v793_v24 = vpop.f32.mrb[7].mxu0 }
 0x3c3   : > { %v630_v25 = vrot.slane %v622_v23, %v629_v19 }
 0x3c5   : > { %v631_v26 = vcombine.high %v630_v25, %v630_v25  ;;  %v638_v27 = vrot.slane %v630_v25, %v629_v19 }
 0x3c7   : > { %v645_v28 = vrot.slane %v631_v26, %v629_v19  ;;  %649 = vst.msk [vmem:[%s220_s26] sm:$0x1] %vm648_vm4, %v638_v27 }
 0x3c9   : > { %650 = vst.msk [vmem:[%s220_s26 + $0x1] sm:$0x1] %vm648_vm4, %v645_v28 }
 0x3ca   : > { %867 = shalt.err (!%p864_p3)
}
 0x3cb   : > { %s868_s14 = scalar_lea.hbm %s1068_s8, 32  ;;  %s872_s17 = scalar_lea.hbm %s1122_s5, 64 }
 0x3cc   : > { %p869_p4 = scmp.ne.s32.totalorder %s1068_s8, %s868_s14  ;;  %p873_p9 = scmp.lt.u32.totalorder %s1068_s8, %s1122_s5 }
 0x3cd   : > { %p874_p10 = scmp.lt.u32.totalorder %s872_s17, %s868_s14  ;;  %p876_p12 = scmp.lt.u32.totalorder %s868_s14, %s1068_s8 }
 0x3ce   : > { %p870_p7 = pnand %p869_p4, %p994_p5 }
 0x3cf   : > { %p875_p11 = por %p874_p10, %p873_p9 }
 0x3d0   : > { %p871_p8 = pneg %p870_p7 }
 0x3d1   : > { %p877_p13 = por %p876_p12, %p875_p11 }
 0x3d3   : > { %p878_p0 = pnand %p877_p13, %p871_p8 }
 0x3d5   : > { %881 = shalt.err (!%p878_p0)
}
 0x3d6   : > { %s925_s26 = smov 1  }
 0x3d7   : > { %803 = dma.vmem_to_hbm [thread:$0]  (%p994_p5), %s1070_s30, 32, %s1068_s8, %s1074_s22, %s919_s10, %s919_s10, %s925_s26  }
 0x3d8 PF: > { %p809_p1 = scmp.ge.s32.totalorder %s916_s21, 2  ;;  %s680_s6 = sand.u32 1, %s904_s18  }
 0x3d9   : > { %s681_s7 = scalar_lea.sflag [#allocation5], %s680_s6 }
 0x3da   : > { %p806_p2 = pnand %p809_p1, %p998_p6 }
 0x3dc   : > { %899 = dma.done.wait (!%p806_p2), %s681_s7, 32  }
 0x3dd   : > { %901 = vsyncadd (!%p806_p2), %s681_s7, 4294967264  ;;  %p15_p3 = scmp.ge.s32.totalorder %s981_s24, 4   ;;  %s1125_s18 = smov %s908_s19 }
 0x3de   : > { %s1126_s19 = smov %s912_s20  ;;  %s1127_s20 = smov %s992_s27 }
 0x3df   : > { %s1128_s21 = smov %s981_s24  ;;  %17 = sbr.rel (!%p15_p3) target bundleno = 3 (0x3), region = 76 }
 0x3e6   :  { %686 = vsyncpa [#allocation5], 1 }
 0x3e7   :  { %688 = vsyncpa [#allocation5 + $0x1], 1 }

</bundles_post_ra>
